<compile_context>
chip_gen: v6e
topology: v6e:2x2x1
jax: 0.10.0
libtpu: 0.0.40
codegen_flags: <defaults>
</compile_context>

<pallas_src>
import jax
import jax.numpy as jnp
from jax import lax
from jax.experimental import pallas as pl
from jax.experimental.pallas import tpu as pltpu


def _rnn_linear_kernel(x_ref, wih_ref, whh_ref, b_ref, wout_ref, bout_ref,
                       out_ref):
    """x_ref:    [BT, T*dim]    time-flattened input rows (t-major)
       wih_ref:  [dim, H]       W_ih^T
       whh_ref:  [H, H]         W_hh^T
       b_ref:    [1, H]         b_ih + b_hh
       wout_ref: [T*H, latent]  W_out^T (t-major rows == Flatten order)
       bout_ref: [1, latent]
       out_ref:  [BT, latent]
    """
    BT = x_ref.shape[0]
    dim, H = wih_ref.shape
    latent = out_ref.shape[1]
    T = wout_ref.shape[0] // H

    wih = wih_ref[...]
    whh = whh_ref[...]
    b = b_ref[...]                                   # [1, H]

    h = jnp.zeros((BT, H), dtype=jnp.float32)
    acc = jnp.zeros((BT, latent), dtype=jnp.float32)

    # T is small and static -> full unroll (gives the LLO scheduler visibility
    # to overlap the off-chain projection / accumulation dots with the serial
    # tanh recurrence).  For much larger T, switch to lax.fori_loop(unroll=2).
    for t in range(T):
        # Input projection for step t: depends only on x -> off the h chain,
        # issued on the MXU while the previous step's tanh runs on the EUP.
        pre_t = jnp.dot(x_ref[:, t * dim:(t + 1) * dim], wih,
                        preferred_element_type=jnp.float32) + b
        # Serial recurrence (critical chain): h @ W_hh -> add -> tanh.
        h = jnp.tanh(pre_t + jnp.dot(h, whh,
                                     preferred_element_type=jnp.float32))
        # Per-step output-Linear accumulation against a static slice of W_out^T
        # rows [t*H:(t+1)*H] -> preserves PyTorch Flatten (t-major) ordering.
        acc = acc + jnp.dot(h, wout_ref[t * H:(t + 1) * H, :],
                            preferred_element_type=jnp.float32)

    out_ref[...] = (acc + bout_ref[...]).astype(out_ref.dtype)


def _batch_tiling(B):
    """Returns (padded_B, batch_tile).

    B is padded to a multiple of 8 (sublane rule).  Small batches run as one
    fat block; larger batches split into an EVEN number of <=256-row tiles so
    the "parallel" batch axis shards across both v7x TensorCores while each
    tile stays fat enough to amortize per-grid-step overhead on single-TC
    v5e/v6e.
    """
    B_pad = pl.cdiv(B, 8) * 8
    if B_pad <= 256:
        return B_pad, B_pad                      # single fat block, grid=(1,)
    steps = pl.cdiv(B_pad, 256)
    if steps % 2:
        steps += 1                               # even #steps -> both v7x TCs busy
    BT = pl.cdiv(pl.cdiv(B_pad, steps), 8) * 8
    return steps * BT, BT


def linear_domain_encoder(x, params):
    """x: [B, T, dim] (PyTorch batch_first convention). Returns [B, latent]."""
    B, T, dim = x.shape
    w_ih = params["w_ih"]          # [H, dim]      (PyTorch weight_ih_l0)
    w_hh = params["w_hh"]          # [H, H]        (PyTorch weight_hh_l0)
    b_ih = params["b_ih"]          # [H]
    b_hh = params["b_hh"]          # [H]
    w_out = params["w_out"]        # [latent, H*T] (PyTorch Linear weight)
    b_out = params["b_out"]        # [latent]
    H = w_hh.shape[0]
    latent = w_out.shape[0]

    # Parameter plumbing in plain JAX (pre-transpose for row-major MXU ops).
    wih_t = jnp.transpose(w_ih).astype(jnp.float32)              # [dim, H]
    whh_t = jnp.transpose(w_hh).astype(jnp.float32)              # [H, H]
    b = (b_ih + b_hh).reshape(1, H).astype(jnp.float32)          # [1, H]
    wout_t = jnp.transpose(w_out).astype(jnp.float32)            # [T*H, latent]
    bout = b_out.reshape(1, latent).astype(jnp.float32)          # [1, latent]

    # Flatten time into the lane axis (free row-major reshape) and pad batch.
    B_pad, BT = _batch_tiling(B)
    xf = x.astype(jnp.float32).reshape(B, T * dim)
    if B_pad != B:
        xf = jnp.pad(xf, ((0, B_pad - B), (0, 0)))

    grid = (B_pad // BT,)

    cost = pl.CostEstimate(
        flops=2 * B_pad * T * (dim * H + H * H + H * latent),
        transcendentals=B_pad * T * H,
        bytes_accessed=4 * (B_pad * T * dim + dim * H + H * H + H
                            + T * H * latent + latent + B_pad * latent),
    )

    out = pl.pallas_call(
        _rnn_linear_kernel,
        out_shape=jax.ShapeDtypeStruct((B_pad, latent), jnp.float32),
        grid=grid,
        in_specs=[
            pl.BlockSpec((BT, T * dim), lambda i: (i, 0)),       # x, batch-tiled
            pl.BlockSpec((dim, H), lambda i: (0, 0)),            # W_ih^T
            pl.BlockSpec((H, H), lambda i: (0, 0)),              # W_hh^T
            pl.BlockSpec((1, H), lambda i: (0, 0)),              # merged bias
            pl.BlockSpec((T * H, latent), lambda i: (0, 0)),     # W_out^T
            pl.BlockSpec((1, latent), lambda i: (0, 0)),         # b_out
        ],
        out_specs=pl.BlockSpec((BT, latent), lambda i: (i, 0)),
        compiler_params=pltpu.CompilerParams(
            dimension_semantics=("parallel",)),                  # batch across TCs (v7x)
        cost_estimate=cost,
    )(xf, wih_t, whh_t, b, wout_t, bout)
    return out[:B]


def _reference(x, params):
    """Pure-JAX reference matching PyTorch nn.RNN + Flatten + Linear."""
    B, T, dim = x.shape
    H = params["w_hh"].shape[0]
    wih_t = params["w_ih"].T
    whh_t = params["w_hh"].T
    b = params["b_ih"] + params["b_hh"]

    def step(h, xt):
        h_new = jnp.tanh(xt @ wih_t + h @ whh_t + b)
        return h_new, h_new

    _, hs = lax.scan(step, jnp.zeros((B, H), jnp.float32),
                     jnp.transpose(x, (1, 0, 2)))                # hs: [T, B, H]
    z = jnp.transpose(hs, (1, 0, 2)).reshape(B, T * H)           # flatten (t-major)
    return z @ params["w_out"].T + params["b_out"]


if __name__ == "__main__":
    # Small shapes consistent with the module's forward:
    #   time_steps=8, dim=32, num_hidden=32, latent_dim=16, batch=2, stochastic=False
    B, T, DIM, H, LATENT = 2, 8, 32, 32, 16

    key = jax.random.PRNGKey(0)
    kx, k1, k2, k3, k4, k5, k6 = jax.random.split(key, 7)
    x = jax.random.normal(kx, (B, T, DIM), dtype=jnp.float32)

    s = 1.0 / jnp.sqrt(H)
    params = {
        "w_ih": jax.random.uniform(k1, (H, DIM), jnp.float32, -s, s),
        "w_hh": jax.random.uniform(k2, (H, H), jnp.float32, -s, s),
        "b_ih": jax.random.uniform(k3, (H,), jnp.float32, -s, s),
        "b_hh": jax.random.uniform(k4, (H,), jnp.float32, -s, s),
        "w_out": jax.random.uniform(k5, (LATENT, H * T), jnp.float32, -s, s),
        "b_out": jax.random.uniform(k6, (LATENT,), jnp.float32, -s, s),
    }

    out = jax.block_until_ready(linear_domain_encoder(x, params))
    ref = jax.block_until_ready(_reference(x, params))

    assert out.shape == (B, LATENT), out.shape
    assert jnp.allclose(out, ref, rtol=1e-3, atol=1e-3), (
        f"max abs err {jnp.max(jnp.abs(out - ref))}")
    print("KERNEL_OK")
</pallas_src>

<mosaic_0001>
module attributes {stable_mosaic.version = 11 : i64} {
  func.func @_rnn_linear_kernel(%arg0: i32, %arg1: memref<8x256xf32, #tpu.memory_space<vmem>>, %arg2: memref<32x32xf32, #tpu.memory_space<vmem>>, %arg3: memref<32x32xf32, #tpu.memory_space<vmem>>, %arg4: memref<1x32xf32, #tpu.memory_space<vmem>>, %arg5: memref<256x16xf32, #tpu.memory_space<vmem>>, %arg6: memref<1x16xf32, #tpu.memory_space<vmem>>, %arg7: memref<8x16xf32, #tpu.memory_space<vmem>>) attributes {dimension_semantics = [#tpu.dimension_semantics<parallel>], iteration_bounds = array<i64: 1>, scalar_prefetch = 0 : i64, scratch_operands = 0 : i64, tpu.core_type = #tpu.core_type<tc>, window_params = [{transform_indices = @transform_0, window_bounds = array<i64: 8, 256>}, {pipeline_mode = #tpu.pipeline_mode<synchronous>, transform_indices = @transform_1, window_bounds = array<i64: 32, 32>}, {pipeline_mode = #tpu.pipeline_mode<synchronous>, transform_indices = @transform_2, window_bounds = array<i64: 32, 32>}, {pipeline_mode = #tpu.pipeline_mode<synchronous>, transform_indices = @transform_3, window_bounds = array<i64: 1, 32>}, {pipeline_mode = #tpu.pipeline_mode<synchronous>, transform_indices = @transform_4, window_bounds = array<i64: 256, 16>}, {pipeline_mode = #tpu.pipeline_mode<synchronous>, transform_indices = @transform_5, window_bounds = array<i64: 1, 16>}, {transform_indices = @transform_6, window_bounds = array<i64: 8, 16>}]} {
    %c0 = arith.constant 0 : index
    %c0_0 = arith.constant 0 : index
    %0 = vector.load %arg2[%c0, %c0_0] : memref<32x32xf32, #tpu.memory_space<vmem>>, vector<32x32xf32>
    %c0_1 = arith.constant 0 : index
    %c0_2 = arith.constant 0 : index
    %1 = vector.load %arg3[%c0_1, %c0_2] : memref<32x32xf32, #tpu.memory_space<vmem>>, vector<32x32xf32>
    %c0_3 = arith.constant 0 : index
    %c0_4 = arith.constant 0 : index
    %2 = vector.load %arg4[%c0_3, %c0_4] : memref<1x32xf32, #tpu.memory_space<vmem>>, vector<1x32xf32>
    %cst = arith.constant 0.000000e+00 : f32
    %3 = vector.broadcast %cst : f32 to vector<8x32xf32>
    %cst_5 = arith.constant 0.000000e+00 : f32
    %4 = vector.broadcast %cst_5 : f32 to vector<8x16xf32>
    %c0_6 = arith.constant 0 : index
    %c0_7 = arith.constant 0 : index
    %5 = vector.load %arg1[%c0_6, %c0_7] : memref<8x256xf32, #tpu.memory_space<vmem>>, vector<8x32xf32>
    %cst_8 = arith.constant dense<0.000000e+00> : vector<8x32xf32>
    %6 = tpu.matmul %5, %0, %cst_8 {dimension_numbers = #tpu.dot_dimension_numbers<[1], [0], [0], [1], [0, 0, 1, 1], [], []>} : vector<8x32xf32>, vector<32x32xf32>, vector<8x32xf32> -> vector<8x32xf32>
    %7 = vector.broadcast %2 : vector<1x32xf32> to vector<8x32xf32>
    %8 = arith.addf %6, %7 : vector<8x32xf32>
    %cst_9 = arith.constant dense<0.000000e+00> : vector<8x32xf32>
    %9 = tpu.matmul %3, %1, %cst_9 {dimension_numbers = #tpu.dot_dimension_numbers<[1], [0], [0], [1], [0, 0, 1, 1], [], []>} : vector<8x32xf32>, vector<32x32xf32>, vector<8x32xf32> -> vector<8x32xf32>
    %10 = arith.addf %8, %9 : vector<8x32xf32>
    %11 = math.tanh %10 : vector<8x32xf32>
    %c0_10 = arith.constant 0 : index
    %c0_11 = arith.constant 0 : index
    %12 = vector.load %arg5[%c0_10, %c0_11] : memref<256x16xf32, #tpu.memory_space<vmem>>, vector<32x16xf32>
    %cst_12 = arith.constant dense<0.000000e+00> : vector<8x16xf32>
    %13 = tpu.matmul %11, %12, %cst_12 {dimension_numbers = #tpu.dot_dimension_numbers<[1], [0], [0], [1], [0, 0, 1, 1], [], []>} : vector<8x32xf32>, vector<32x16xf32>, vector<8x16xf32> -> vector<8x16xf32>
    %14 = arith.addf %4, %13 : vector<8x16xf32>
    %c0_13 = arith.constant 0 : index
    %c32 = arith.constant 32 : index
    %15 = vector.load %arg1[%c0_13, %c32] : memref<8x256xf32, #tpu.memory_space<vmem>>, vector<8x32xf32>
    %cst_14 = arith.constant dense<0.000000e+00> : vector<8x32xf32>
    %16 = tpu.matmul %15, %0, %cst_14 {dimension_numbers = #tpu.dot_dimension_numbers<[1], [0], [0], [1], [0, 0, 1, 1], [], []>} : vector<8x32xf32>, vector<32x32xf32>, vector<8x32xf32> -> vector<8x32xf32>
    %17 = vector.broadcast %2 : vector<1x32xf32> to vector<8x32xf32>
    %18 = arith.addf %16, %17 : vector<8x32xf32>
    %cst_15 = arith.constant dense<0.000000e+00> : vector<8x32xf32>
    %19 = tpu.matmul %11, %1, %cst_15 {dimension_numbers = #tpu.dot_dimension_numbers<[1], [0], [0], [1], [0, 0, 1, 1], [], []>} : vector<8x32xf32>, vector<32x32xf32>, vector<8x32xf32> -> vector<8x32xf32>
    %20 = arith.addf %18, %19 : vector<8x32xf32>
    %21 = math.tanh %20 : vector<8x32xf32>
    %c32_16 = arith.constant 32 : index
    %c0_17 = arith.constant 0 : index
    %22 = vector.load %arg5[%c32_16, %c0_17] : memref<256x16xf32, #tpu.memory_space<vmem>>, vector<32x16xf32>
    %cst_18 = arith.constant dense<0.000000e+00> : vector<8x16xf32>
    %23 = tpu.matmul %21, %22, %cst_18 {dimension_numbers = #tpu.dot_dimension_numbers<[1], [0], [0], [1], [0, 0, 1, 1], [], []>} : vector<8x32xf32>, vector<32x16xf32>, vector<8x16xf32> -> vector<8x16xf32>
    %24 = arith.addf %14, %23 : vector<8x16xf32>
    %c0_19 = arith.constant 0 : index
    %c64 = arith.constant 64 : index
    %25 = vector.load %arg1[%c0_19, %c64] : memref<8x256xf32, #tpu.memory_space<vmem>>, vector<8x32xf32>
    %cst_20 = arith.constant dense<0.000000e+00> : vector<8x32xf32>
    %26 = tpu.matmul %25, %0, %cst_20 {dimension_numbers = #tpu.dot_dimension_numbers<[1], [0], [0], [1], [0, 0, 1, 1], [], []>} : vector<8x32xf32>, vector<32x32xf32>, vector<8x32xf32> -> vector<8x32xf32>
    %27 = vector.broadcast %2 : vector<1x32xf32> to vector<8x32xf32>
    %28 = arith.addf %26, %27 : vector<8x32xf32>
    %cst_21 = arith.constant dense<0.000000e+00> : vector<8x32xf32>
    %29 = tpu.matmul %21, %1, %cst_21 {dimension_numbers = #tpu.dot_dimension_numbers<[1], [0], [0], [1], [0, 0, 1, 1], [], []>} : vector<8x32xf32>, vector<32x32xf32>, vector<8x32xf32> -> vector<8x32xf32>
    %30 = arith.addf %28, %29 : vector<8x32xf32>
    %31 = math.tanh %30 : vector<8x32xf32>
    %c64_22 = arith.constant 64 : index
    %c0_23 = arith.constant 0 : index
    %32 = vector.load %arg5[%c64_22, %c0_23] : memref<256x16xf32, #tpu.memory_space<vmem>>, vector<32x16xf32>
    %cst_24 = arith.constant dense<0.000000e+00> : vector<8x16xf32>
    %33 = tpu.matmul %31, %32, %cst_24 {dimension_numbers = #tpu.dot_dimension_numbers<[1], [0], [0], [1], [0, 0, 1, 1], [], []>} : vector<8x32xf32>, vector<32x16xf32>, vector<8x16xf32> -> vector<8x16xf32>
    %34 = arith.addf %24, %33 : vector<8x16xf32>
    %c0_25 = arith.constant 0 : index
    %c96 = arith.constant 96 : index
    %35 = vector.load %arg1[%c0_25, %c96] : memref<8x256xf32, #tpu.memory_space<vmem>>, vector<8x32xf32>
    %cst_26 = arith.constant dense<0.000000e+00> : vector<8x32xf32>
    %36 = tpu.matmul %35, %0, %cst_26 {dimension_numbers = #tpu.dot_dimension_numbers<[1], [0], [0], [1], [0, 0, 1, 1], [], []>} : vector<8x32xf32>, vector<32x32xf32>, vector<8x32xf32> -> vector<8x32xf32>
    %37 = vector.broadcast %2 : vector<1x32xf32> to vector<8x32xf32>
    %38 = arith.addf %36, %37 : vector<8x32xf32>
    %cst_27 = arith.constant dense<0.000000e+00> : vector<8x32xf32>
    %39 = tpu.matmul %31, %1, %cst_27 {dimension_numbers = #tpu.dot_dimension_numbers<[1], [0], [0], [1], [0, 0, 1, 1], [], []>} : vector<8x32xf32>, vector<32x32xf32>, vector<8x32xf32> -> vector<8x32xf32>
    %40 = arith.addf %38, %39 : vector<8x32xf32>
    %41 = math.tanh %40 : vector<8x32xf32>
    %c96_28 = arith.constant 96 : index
    %c0_29 = arith.constant 0 : index
    %42 = vector.load %arg5[%c96_28, %c0_29] : memref<256x16xf32, #tpu.memory_space<vmem>>, vector<32x16xf32>
    %cst_30 = arith.constant dense<0.000000e+00> : vector<8x16xf32>
    %43 = tpu.matmul %41, %42, %cst_30 {dimension_numbers = #tpu.dot_dimension_numbers<[1], [0], [0], [1], [0, 0, 1, 1], [], []>} : vector<8x32xf32>, vector<32x16xf32>, vector<8x16xf32> -> vector<8x16xf32>
    %44 = arith.addf %34, %43 : vector<8x16xf32>
    %c0_31 = arith.constant 0 : index
    %c128 = arith.constant 128 : index
    %45 = vector.load %arg1[%c0_31, %c128] : memref<8x256xf32, #tpu.memory_space<vmem>>, vector<8x32xf32>
    %cst_32 = arith.constant dense<0.000000e+00> : vector<8x32xf32>
    %46 = tpu.matmul %45, %0, %cst_32 {dimension_numbers = #tpu.dot_dimension_numbers<[1], [0], [0], [1], [0, 0, 1, 1], [], []>} : vector<8x32xf32>, vector<32x32xf32>, vector<8x32xf32> -> vector<8x32xf32>
    %47 = vector.broadcast %2 : vector<1x32xf32> to vector<8x32xf32>
    %48 = arith.addf %46, %47 : vector<8x32xf32>
    %cst_33 = arith.constant dense<0.000000e+00> : vector<8x32xf32>
    %49 = tpu.matmul %41, %1, %cst_33 {dimension_numbers = #tpu.dot_dimension_numbers<[1], [0], [0], [1], [0, 0, 1, 1], [], []>} : vector<8x32xf32>, vector<32x32xf32>, vector<8x32xf32> -> vector<8x32xf32>
    %50 = arith.addf %48, %49 : vector<8x32xf32>
    %51 = math.tanh %50 : vector<8x32xf32>
    %c128_34 = arith.constant 128 : index
    %c0_35 = arith.constant 0 : index
    %52 = vector.load %arg5[%c128_34, %c0_35] : memref<256x16xf32, #tpu.memory_space<vmem>>, vector<32x16xf32>
    %cst_36 = arith.constant dense<0.000000e+00> : vector<8x16xf32>
    %53 = tpu.matmul %51, %52, %cst_36 {dimension_numbers = #tpu.dot_dimension_numbers<[1], [0], [0], [1], [0, 0, 1, 1], [], []>} : vector<8x32xf32>, vector<32x16xf32>, vector<8x16xf32> -> vector<8x16xf32>
    %54 = arith.addf %44, %53 : vector<8x16xf32>
    %c0_37 = arith.constant 0 : index
    %c160 = arith.constant 160 : index
    %55 = vector.load %arg1[%c0_37, %c160] : memref<8x256xf32, #tpu.memory_space<vmem>>, vector<8x32xf32>
    %cst_38 = arith.constant dense<0.000000e+00> : vector<8x32xf32>
    %56 = tpu.matmul %55, %0, %cst_38 {dimension_numbers = #tpu.dot_dimension_numbers<[1], [0], [0], [1], [0, 0, 1, 1], [], []>} : vector<8x32xf32>, vector<32x32xf32>, vector<8x32xf32> -> vector<8x32xf32>
    %57 = vector.broadcast %2 : vector<1x32xf32> to vector<8x32xf32>
    %58 = arith.addf %56, %57 : vector<8x32xf32>
    %cst_39 = arith.constant dense<0.000000e+00> : vector<8x32xf32>
    %59 = tpu.matmul %51, %1, %cst_39 {dimension_numbers = #tpu.dot_dimension_numbers<[1], [0], [0], [1], [0, 0, 1, 1], [], []>} : vector<8x32xf32>, vector<32x32xf32>, vector<8x32xf32> -> vector<8x32xf32>
    %60 = arith.addf %58, %59 : vector<8x32xf32>
    %61 = math.tanh %60 : vector<8x32xf32>
    %c160_40 = arith.constant 160 : index
    %c0_41 = arith.constant 0 : index
    %62 = vector.load %arg5[%c160_40, %c0_41] : memref<256x16xf32, #tpu.memory_space<vmem>>, vector<32x16xf32>
    %cst_42 = arith.constant dense<0.000000e+00> : vector<8x16xf32>
    %63 = tpu.matmul %61, %62, %cst_42 {dimension_numbers = #tpu.dot_dimension_numbers<[1], [0], [0], [1], [0, 0, 1, 1], [], []>} : vector<8x32xf32>, vector<32x16xf32>, vector<8x16xf32> -> vector<8x16xf32>
    %64 = arith.addf %54, %63 : vector<8x16xf32>
    %c0_43 = arith.constant 0 : index
    %c192 = arith.constant 192 : index
    %65 = vector.load %arg1[%c0_43, %c192] : memref<8x256xf32, #tpu.memory_space<vmem>>, vector<8x32xf32>
    %cst_44 = arith.constant dense<0.000000e+00> : vector<8x32xf32>
    %66 = tpu.matmul %65, %0, %cst_44 {dimension_numbers = #tpu.dot_dimension_numbers<[1], [0], [0], [1], [0, 0, 1, 1], [], []>} : vector<8x32xf32>, vector<32x32xf32>, vector<8x32xf32> -> vector<8x32xf32>
    %67 = vector.broadcast %2 : vector<1x32xf32> to vector<8x32xf32>
    %68 = arith.addf %66, %67 : vector<8x32xf32>
    %cst_45 = arith.constant dense<0.000000e+00> : vector<8x32xf32>
    %69 = tpu.matmul %61, %1, %cst_45 {dimension_numbers = #tpu.dot_dimension_numbers<[1], [0], [0], [1], [0, 0, 1, 1], [], []>} : vector<8x32xf32>, vector<32x32xf32>, vector<8x32xf32> -> vector<8x32xf32>
    %70 = arith.addf %68, %69 : vector<8x32xf32>
    %71 = math.tanh %70 : vector<8x32xf32>
    %c192_46 = arith.constant 192 : index
    %c0_47 = arith.constant 0 : index
    %72 = vector.load %arg5[%c192_46, %c0_47] : memref<256x16xf32, #tpu.memory_space<vmem>>, vector<32x16xf32>
    %cst_48 = arith.constant dense<0.000000e+00> : vector<8x16xf32>
    %73 = tpu.matmul %71, %72, %cst_48 {dimension_numbers = #tpu.dot_dimension_numbers<[1], [0], [0], [1], [0, 0, 1, 1], [], []>} : vector<8x32xf32>, vector<32x16xf32>, vector<8x16xf32> -> vector<8x16xf32>
    %74 = arith.addf %64, %73 : vector<8x16xf32>
    %c0_49 = arith.constant 0 : index
    %c224 = arith.constant 224 : index
    %75 = vector.load %arg1[%c0_49, %c224] : memref<8x256xf32, #tpu.memory_space<vmem>>, vector<8x32xf32>
    %cst_50 = arith.constant dense<0.000000e+00> : vector<8x32xf32>
    %76 = tpu.matmul %75, %0, %cst_50 {dimension_numbers = #tpu.dot_dimension_numbers<[1], [0], [0], [1], [0, 0, 1, 1], [], []>} : vector<8x32xf32>, vector<32x32xf32>, vector<8x32xf32> -> vector<8x32xf32>
    %77 = vector.broadcast %2 : vector<1x32xf32> to vector<8x32xf32>
    %78 = arith.addf %76, %77 : vector<8x32xf32>
    %cst_51 = arith.constant dense<0.000000e+00> : vector<8x32xf32>
    %79 = tpu.matmul %71, %1, %cst_51 {dimension_numbers = #tpu.dot_dimension_numbers<[1], [0], [0], [1], [0, 0, 1, 1], [], []>} : vector<8x32xf32>, vector<32x32xf32>, vector<8x32xf32> -> vector<8x32xf32>
    %80 = arith.addf %78, %79 : vector<8x32xf32>
    %81 = math.tanh %80 : vector<8x32xf32>
    %c224_52 = arith.constant 224 : index
    %c0_53 = arith.constant 0 : index
    %82 = vector.load %arg5[%c224_52, %c0_53] : memref<256x16xf32, #tpu.memory_space<vmem>>, vector<32x16xf32>
    %cst_54 = arith.constant dense<0.000000e+00> : vector<8x16xf32>
    %83 = tpu.matmul %81, %82, %cst_54 {dimension_numbers = #tpu.dot_dimension_numbers<[1], [0], [0], [1], [0, 0, 1, 1], [], []>} : vector<8x32xf32>, vector<32x16xf32>, vector<8x16xf32> -> vector<8x16xf32>
    %84 = arith.addf %74, %83 : vector<8x16xf32>
    %c0_55 = arith.constant 0 : index
    %c0_56 = arith.constant 0 : index
    %85 = vector.load %arg6[%c0_55, %c0_56] : memref<1x16xf32, #tpu.memory_space<vmem>>, vector<1x16xf32>
    %86 = vector.broadcast %85 : vector<1x16xf32> to vector<8x16xf32>
    %87 = arith.addf %84, %86 : vector<8x16xf32>
    %c0_57 = arith.constant 0 : index
    %c0_58 = arith.constant 0 : index
    %88 = vector.load %arg7[%c0_57, %c0_58] : memref<8x16xf32, #tpu.memory_space<vmem>>, vector<8x16xf32>
    tpu.vector_store %arg7[%c0_57, %c0_58], %87 {strides = array<i32>} : memref<8x16xf32, #tpu.memory_space<vmem>>, vector<8x16xf32>,
    return
  }
  func.func @transform_0(%arg0: i32) -> (i32, i32) {
    %c0_i32 = arith.constant 0 : i32
    %c0_i32_0 = arith.constant 0 : i32
    return %arg0, %c0_i32 : i32, i32
  }
  func.func @transform_1(%arg0: i32) -> (i32, i32) {
    %c0_i32 = arith.constant 0 : i32
    %c0_i32_0 = arith.constant 0 : i32
    %c0_i32_1 = arith.constant 0 : i32
    return %c0_i32, %c0_i32_0 : i32, i32
  }
  func.func @transform_2(%arg0: i32) -> (i32, i32) {
    %c0_i32 = arith.constant 0 : i32
    %c0_i32_0 = arith.constant 0 : i32
    %c0_i32_1 = arith.constant 0 : i32
    return %c0_i32, %c0_i32_0 : i32, i32
  }
  func.func @transform_3(%arg0: i32) -> (i32, i32) {
    %c0_i32 = arith.constant 0 : i32
    %c0_i32_0 = arith.constant 0 : i32
    %c0_i32_1 = arith.constant 0 : i32
    return %c0_i32, %c0_i32_0 : i32, i32
  }
  func.func @transform_4(%arg0: i32) -> (i32, i32) {
    %c0_i32 = arith.constant 0 : i32
    %c0_i32_0 = arith.constant 0 : i32
    %c0_i32_1 = arith.constant 0 : i32
    return %c0_i32, %c0_i32_0 : i32, i32
  }
  func.func @transform_5(%arg0: i32) -> (i32, i32) {
    %c0_i32 = arith.constant 0 : i32
    %c0_i32_0 = arith.constant 0 : i32
    %c0_i32_1 = arith.constant 0 : i32
    return %c0_i32, %c0_i32_0 : i32, i32
  }
  func.func @transform_6(%arg0: i32) -> (i32, i32) {
    %c0_i32 = arith.constant 0 : i32
    %c0_i32_0 = arith.constant 0 : i32
    return %arg0, %c0_i32 : i32, i32
  }
}

</mosaic_0001>

<bundles_post_ra>
// kernel: tpu_custom_call.1
= control target key start
LH: loop header
LB: loop body
LE: loop exit
PB: predicated region body
PF: predicated region fallthrough
CT: control target
= control target key end

     0   :  { %v2310_v2 = vmov 0.0   ;;  %s2759_s0 = inlined_call_operand.vmem [shape: f32[8,256], index: 0, kind: input, shape index: {}]   ;;  %s2760_s1 = inlined_call_operand.vmem [shape: f32[32,32], index: 1, kind: input, shape index: {}]   ;;  %s2761_s2 = inlined_call_operand.vmem [shape: f32[32,32], index: 2, kind: input, shape index: {}]   ;;  %s2762_s3 = inlined_call_operand.vmem [shape: f32[1,32], index: 3, kind: input, shape index: {}]   ;;  %s2763_s4 = inlined_call_operand.vmem [shape: f32[256,16], index: 4, kind: input, shape index: {}]   ;;  %s2764_s5 = inlined_call_operand.vmem [shape: f32[1,16], index: 5, kind: input, shape index: {}]   ;;  %s2765_s6 = inlined_call_operand.hbm [shape: f32[8,16], index: 6, kind: output, shape index: {}]  }
   0x1   :  { %v2354_v0 = vld [vmem:[%s2760_s1 + $0x18] sm:$0xff]  ;;  %2002 = vmatprep.subr.mxu0 %v2310_v2  ;;  %2013 = vmatprep.subr.mxu1 %v2310_v2  ;;  %v2366_v3 = vld [vmem:[%s2760_s1 + $0x10] sm:$0xff]  ;;  %v2380_v5 = vld [vmem:[%s2760_s1 + $0x8] sm:$0xff] }
   0x2   :  { %v2359_v1 = vld [vmem:[%s2761_s2 + $0x18] sm:$0xff]  ;;  %v2371_v4 = vld [vmem:[%s2761_s2 + $0x10] sm:$0xff]  ;;  %2003 = vmatpush3.msra.mxu0 %v2354_v0  ;;  %v2385_v6 = vld [vmem:[%s2761_s2 + $0x8] sm:$0xff] }
   0x3   :  { %2014 = vmatpush3.msra.mxu1 %v2359_v1  ;;  %2004 = vmatprep.subr.mxu0 %v2310_v2 }
   0x4   :  { %2015 = vmatprep.subr.mxu1 %v2310_v2 }
   0x5   :  { %11 = vsyncpa [#allocation3], 0  ;;  %2005 = vmatpush3.msra.mxu0 %v2366_v3  ;;  %2016 = vmatpush3.msra.mxu1 %v2371_v4  ;;  %v2394_v7 = vld [vmem:[%s2760_s1] sm:$0xff]  ;;  %vm40_vm0 = vcmask 261120   ;;  %vm2311_vm1 = vmmov 0   ;;  %s2312_s1 = smov 96  }
   0x6   :  { %2006 = vmatprep.subr.mxu0 %v2310_v2  ;;  %2017 = vmatprep.subr.mxu1 %v2310_v2  ;;  %v2401_v8 = vld [vmem:[%s2761_s2] sm:$0xff]  ;;  %s2313_s2 = smov 64   ;;  %v192_v18 = vld [vmem:[%s2763_s4 + $0x18] sm:$0xff]  ;;  %v191_v20 = vld [vmem:[%s2763_s4 + $0x10] sm:$0xff]  ;;  %s2314_s8 = smov 32   ;;  %vm1841_vm2 = vcmask 130048  }
   0x7   :  { %2007 = vmatpush3.msra.mxu0 %v2380_v5  ;;  %2018 = vmatpush3.msra.mxu1 %v2385_v6  ;;  %v2408_v9 = vld [vmem:[%s2759_s0] sm:$0xff]  ;;  %v190_v21 = vld [vmem:[%s2763_s4 + $0x8] sm:$0xff]  ;;  %v345_v23 = vld [vmem:[%s2763_s4 + $0x38] sm:$0xff] }
   0x8   :  { %2008 = vmatprep.subr.mxu0 %v2310_v2  ;;  %2019 = vmatprep.subr.mxu1 %v2310_v2  ;;  %v2451_v11 = vld [vmem:[%s2762_s3] ss:$0 sm:$0xff]  ;;  %v344_v24 = vld [vmem:[%s2763_s4 + $0x30] sm:$0xff]  ;;  %v343_v25 = vld [vmem:[%s2763_s4 + $0x28] sm:$0xff] }
   0x9   :  { %2009 = vmatpush3.msra.mxu0 %v2394_v7  ;;  %2010 = vmatprep.mubr.msk.f32.mxu0 %vm2311_vm1, %v2310_v2  ;;  %v189_v22 = vld [vmem:[%s2763_s4] sm:$0xff]  ;;  %v638_v37 = vld [vmem:[%s2763_s4 + $0x58] sm:$0xff]  ;;  %v637_v38 = vld [vmem:[%s2763_s4 + $0x50] sm:$0xff] }
   0xa   :  { %2020 = vmatpush3.msra.mxu1 %v2401_v8  ;;  %2021 = vmatprep.mubr.msk.f32.mxu1 %vm2311_vm1, %v2310_v2  ;;  %v342_v26 = vld [vmem:[%s2763_s4 + $0x20] sm:$0xff]  ;;  %v636_v39 = vld [vmem:[%s2763_s4 + $0x48] sm:$0xff]  ;;  %v862_v53 = vld [vmem:[%s2763_s4 + $0x78] sm:$0xff] }
   0xb   :  { %2011 = vmatmul.mubr.msk.f32.vlgmr.msra.gmra.mxu0 %vm40_vm0, %v2408_v9  ;;  %2022 = vmatmul.mubr.f32.vlgmr.msra.gmra.mxu1 %v2310_v2  ;;  %v635_v40 = vld [vmem:[%s2763_s4 + $0x40] sm:$0xff]  ;;  %v861_v54 = vld [vmem:[%s2763_s4 + $0x70] sm:$0xff]  ;;  %v860_v55 = vld [vmem:[%s2763_s4 + $0x68] sm:$0xff] }
   0xc   :  { %193 = vrot.lane.b32.xlu0 %v2408_v9, %s2312_s1  ;;  %2024 = vmatprep.subr.mxu0 %v2310_v2  ;;  %v859_v56 = vld [vmem:[%s2763_s4 + $0x60] sm:$0xff]  ;;  %v937_v57 = vld [vmem:[%s2759_s0 + $0x8] sm:$0xff] }
   0xd   :  { %2025 = vmatpush3.msra.mxu0 %v2354_v0  ;;  %2035 = vmatprep.subr.mxu1 %v2310_v2 }
   0xe   :  { %2026 = vmatprep.subr.mxu0 %v2310_v2  ;;  %2036 = vmatpush3.msra.mxu1 %v2359_v1 }
   0xf   :  { %2027 = vmatpush3.msra.mxu0 %v2366_v3  ;;  %2037 = vmatprep.subr.mxu1 %v2310_v2 }
  0x10   :  { %2028 = vmatprep.subr.mxu0 %v2310_v2  ;;  %2038 = vmatpush3.msra.mxu1 %v2371_v4 }
  0x11   :  { %2029 = vmatpush3.msra.mxu0 %v2380_v5  ;;  %2032 = vmatprep.mubr.msk.f32.mxu0 %vm2311_vm1, %v2310_v2 }
  0x12   :  { %2030 = vmatprep.subr.mxu0 %v2310_v2  ;;  %2039 = vmatprep.subr.mxu1 %v2310_v2 }
  0x13   :  { %2031 = vmatpush3.msra.mxu0 %v2394_v7  ;;  %2040 = vmatpush3.msra.mxu1 %v2385_v6 }
  0x14   :  { %2041 = vmatprep.subr.mxu1 %v2310_v2  ;;  %2043 = vmatprep.mubr.msk.f32.mxu1 %vm2311_vm1, %v2310_v2 }
  0x15   :  { %2042 = vmatpush3.msra.mxu1 %v2401_v8  ;;  %2046 = vmatprep.subr.mxu0 %v2310_v2 }
  0x16   :  { %2057 = vmatprep.subr.mxu1 %v2310_v2  ;;  %489 = vrot.lane.b32.xlu0 %v2408_v9, %s2313_s2 }
  0x17   :  { %713 = vrot.lane.b32.xlu1 %v2408_v9, %s2314_s8 }
  0x1a   :  { %1385 = vrot.lane.b32.xlu0 %v937_v57, %s2313_s2 }
  0x1b   :  { %1161 = vrot.lane.b32.xlu1 %v937_v57, %s2312_s1 }
  0x1f   :  { %1609 = vrot.lane.b32.xlu1 %v937_v57, %s2314_s8 }
  0x7e   :  { %v194_v10 = vpop.permute.xlu0 %193 }
  0x7f   :  { %2033 = vmatmul.mubr.msk.f32.vlgmr.msra.gmra.mxu0 %vm40_vm0, %v194_v10 }
  0x80   :  { %2054 = vmatprep.mubr.msk.f32.mxu0 %vm2311_vm1, %v2310_v2  ;;  %2047 = vmatpush3.msra.mxu0 %v345_v23 }
  0x81   :  { %2048 = vmatprep.subr.mxu0 %v2310_v2 }
  0x82   :  { %2049 = vmatpush3.msra.mxu0 %v344_v24 }
  0x83   :  { %2050 = vmatprep.subr.mxu0 %v2310_v2 }
  0x84   :  { %2051 = vmatpush3.msra.mxu0 %v343_v25 }
  0x85   :  { %2052 = vmatprep.subr.mxu0 %v2310_v2 }
  0x86   :  { %2053 = vmatpush3.msra.mxu0 %v342_v26 }
  0x87   :  { %2068 = vmatprep.subr.mxu0 %v2310_v2 }
  0x88   :  { %v490_v36 = vpop.permute.xlu0 %489 }
  0x89   :  { %v714_v41 = vpop.permute.xlu1 %713 }
  0xcb   :  { %v110_v12 = vpop.f32.mrf.mxu0  ;;  %v183_v13 = vpop.f32.mrf.mxu1 }
  0xcc   :  { %v111_v14 = vadd.f32 %v2451_v11, %v110_v12 }
  0xcd   :  { %v2012_v15 = vpop.f32.mrf.mxu0  ;;  %v2023_v16 = vpop.f32.mrf.mxu1 }
  0xce   :  { %v187_v17 = vadd.f32 %v183_v13, %v111_v14  ;;  %v1086_v15 = vld [vmem:[%s2763_s4 + $0x98] sm:$0xff]  ;;  %v1085_v16 = vld [vmem:[%s2763_s4 + $0x90] sm:$0xff] }
  0xd0   :  { %2272 = vtanh.f32 %v187_v17  ;;  %v1084_v17 = vld [vmem:[%s2763_s4 + $0x88] sm:$0xff] }
  0xdd   :  { %v2273_v19 = vpop.eup %2272 }
  0xde   :  { %2044 = vmatmul.mubr.msk.f32.vlgmr.msra.gmra.mxu1 %vm40_vm0, %v2273_v19 }
  0xdf   :  { %2058 = vmatpush3.msra.mxu1 %v192_v18  ;;  %2065 = vmatprep.mubr.msk.f32.mxu1 %vm2311_vm1, %v2310_v2  ;;  %v1083_v18 = vld [vmem:[%s2763_s4 + $0x80] sm:$0xff] }
  0xe0   :  { %2059 = vmatprep.subr.mxu1 %v2310_v2 }
  0xe1   :  { %2060 = vmatpush3.msra.mxu1 %v191_v20 }
  0xe2   :  { %2061 = vmatprep.subr.mxu1 %v2310_v2 }
  0xe3   :  { %2062 = vmatpush3.msra.mxu1 %v190_v21 }
  0xe4   :  { %2063 = vmatprep.subr.mxu1 %v2310_v2 }
  0xe5   :  { %2064 = vmatpush3.msra.mxu1 %v189_v22 }
  0xe6   :  { %2066 = vmatmul.mubr.msk.f32.vlgmr.msra.gmra.mxu1 %vm40_vm0, %v2273_v19  ;;  %2079 = vmatprep.subr.mxu1 %v2310_v2  ;;  %v1162_v19 = vpop.permute.xlu1 %1161 }
  0xe7   :  { %2080 = vmatpush3.msra.mxu1 %v2359_v1  ;;  %2087 = vmatprep.mubr.msk.f32.mxu1 %vm2311_vm1, %v2310_v2 }
  0xe8   :  { %2081 = vmatprep.subr.mxu1 %v2310_v2 }
  0xe9   :  { %2082 = vmatpush3.msra.mxu1 %v2371_v4 }
  0xea   :  { %2083 = vmatprep.subr.mxu1 %v2310_v2 }
  0xeb   :  { %2084 = vmatpush3.msra.mxu1 %v2385_v6 }
  0xec   :  { %2085 = vmatprep.subr.mxu1 %v2310_v2 }
  0xed   :  { %2086 = vmatpush3.msra.mxu1 %v2401_v8 }
  0xee   :  { %2101 = vmatprep.subr.mxu1 %v2310_v2 }
 0x13f   :  { %v263_v27 = vpop.f32.mrf.mxu0 }
 0x140   :  { %v264_v29 = vadd.f32 %v2451_v11, %v263_v27 }
 0x141   :  { %v2034_v28 = vpop.f32.mrf.mxu0 }
 0x19e   :  { %v336_v30 = vpop.f32.mrf.mxu1 }
 0x19f   :  { %v340_v31 = vadd.f32 %v336_v30, %v264_v29  ;;  %v1310_v30 = vld [vmem:[%s2763_s4 + $0xb8] sm:$0xff] }
 0x1a0   :  { %v2045_v32 = vpop.f32.mrf.mxu1 }
 0x1a1   :  { %2274 = vtanh.f32 %v340_v31  ;;  %v1309_v31 = vld [vmem:[%s2763_s4 + $0xb0] sm:$0xff]  ;;  %v1308_v32 = vld [vmem:[%s2763_s4 + $0xa8] sm:$0xff] }
 0x1a6   :  { %v2503_v33 = vpop.f32.mrf.mxu1 }
 0x1a8   :  { %v2067_v34 = vpop.f32.mrf.mxu1 }
 0x1a9   :  { %v1386_v34 = vpop.permute.xlu0 %1385 }
 0x1ae   :  { %v2275_v35 = vpop.eup %2274 }
 0x1af   :  { %2055 = vmatmul.mubr.msk.f32.vlgmr.msra.gmra.mxu0 %vm40_vm0, %v2275_v35  ;;  %2088 = vmatmul.mubr.msk.f32.vlgmr.msra.gmra.mxu1 %vm40_vm0, %v2275_v35 }
 0x1b0   :  { %2069 = vmatpush3.msra.mxu0 %v2354_v0  ;;  %2076 = vmatprep.mubr.msk.f32.mxu0 %vm2311_vm1, %v2310_v2 }
 0x1b1   :  { %2070 = vmatprep.subr.mxu0 %v2310_v2  ;;  %2102 = vmatpush3.msra.mxu1 %v2354_v0 }
 0x1b2   :  { %2071 = vmatpush3.msra.mxu0 %v2366_v3  ;;  %2103 = vmatprep.subr.mxu1 %v2310_v2 }
 0x1b3   :  { %2072 = vmatprep.subr.mxu0 %v2310_v2  ;;  %2104 = vmatpush3.msra.mxu1 %v2366_v3 }
 0x1b4   :  { %2073 = vmatpush3.msra.mxu0 %v2380_v5  ;;  %2105 = vmatprep.subr.mxu1 %v2310_v2 }
 0x1b5   :  { %2074 = vmatprep.subr.mxu0 %v2310_v2  ;;  %2106 = vmatpush3.msra.mxu1 %v2380_v5 }
 0x1b6   :  { %2075 = vmatpush3.msra.mxu0 %v2394_v7  ;;  %2107 = vmatprep.subr.mxu1 %v2310_v2 }
 0x1b7   :  { %2077 = vmatmul.mubr.msk.f32.vlgmr.msra.gmra.mxu0 %vm40_vm0, %v490_v36  ;;  %2090 = vmatprep.subr.mxu0 %v2310_v2 }
 0x1b8   :  { %2098 = vmatprep.mubr.msk.f32.mxu0 %vm2311_vm1, %v2310_v2  ;;  %2108 = vmatpush3.msra.mxu1 %v2394_v7 }
 0x1b9   :  { %2109 = vmatprep.mubr.msk.f32.mxu1 %vm2311_vm1, %v2310_v2  ;;  %2123 = vmatprep.subr.mxu1 %v2310_v2 }
 0x1ba   :  { %2091 = vmatpush3.msra.mxu0 %v638_v37  ;;  %2110 = vmatmul.mubr.msk.f32.vlgmr.msra.gmra.mxu1 %vm40_vm0, %v714_v41 }
 0x1bb   :  { %2092 = vmatprep.subr.mxu0 %v2310_v2  ;;  %2131 = vmatprep.mubr.msk.f32.mxu1 %vm2311_vm1, %v2310_v2 }
 0x1bc   :  { %2093 = vmatpush3.msra.mxu0 %v637_v38  ;;  %2124 = vmatpush3.msra.mxu1 %v862_v53 }
 0x1bd   :  { %2094 = vmatprep.subr.mxu0 %v2310_v2  ;;  %2125 = vmatprep.subr.mxu1 %v2310_v2 }
 0x1be   :  { %2095 = vmatpush3.msra.mxu0 %v636_v39  ;;  %2126 = vmatpush3.msra.mxu1 %v861_v54 }
 0x1bf   :  { %2096 = vmatprep.subr.mxu0 %v2310_v2  ;;  %2127 = vmatprep.subr.mxu1 %v2310_v2 }
 0x1c0   :  { %2097 = vmatpush3.msra.mxu0 %v635_v40  ;;  %2128 = vmatpush3.msra.mxu1 %v860_v55 }
 0x1c1   :  { %2112 = vmatprep.subr.mxu0 %v2310_v2  ;;  %2129 = vmatprep.subr.mxu1 %v2310_v2 }
 0x1c2   :  { %2130 = vmatpush3.msra.mxu1 %v859_v56 }
 0x1c3   :  { %2145 = vmatprep.subr.mxu1 %v2310_v2 }
 0x26f   :  { %v415_v42 = vpop.f32.mrf.mxu0  ;;  %v629_v43 = vpop.f32.mrf.mxu1 }
 0x270   :  { %v486_v58 = vadd.f32 %v2503_v33, %v415_v42  ;;  %v1307_v33 = vld [vmem:[%s2763_s4 + $0xa0] sm:$0xff] }
 0x271   :  { %v2056_v44 = vpop.f32.mrf.mxu0  ;;  %v2089_v45 = vpop.f32.mrf.mxu1 }
 0x272   :  { %v1610_v45 = vpop.permute.xlu1 %1609 }
 0x277   :  { %v559_v46 = vpop.f32.mrf.mxu0 }
 0x278   :  { %v560_v47 = vadd.f32 %v2451_v11, %v559_v46 }
 0x279   :  { %v2078_v48 = vpop.f32.mrf.mxu0 }
 0x27a   :  { %v633_v49 = vadd.f32 %v629_v43, %v560_v47  ;;  %v783_v51 = vpop.f32.mrf.mxu1 }
 0x27b   :  { %v784_v62 = vadd.f32 %v2451_v11, %v783_v51 }
 0x27c   :  { %2276 = vtanh.f32 %v633_v49  ;;  %v2111_v52 = vpop.f32.mrf.mxu1 }
 0x289   :  { %v2277_v50 = vpop.eup %2276 }
 0x28a   :  { %2099 = vmatmul.mubr.msk.f32.vlgmr.msra.gmra.mxu0 %vm40_vm0, %v2277_v50 }
 0x28b   :  { %2113 = vmatpush3.msra.mxu0 %v2359_v1  ;;  %2120 = vmatprep.mubr.msk.f32.mxu0 %vm2311_vm1, %v2310_v2 }
 0x28c   :  { %2114 = vmatprep.subr.mxu0 %v2310_v2 }
 0x28d   :  { %2115 = vmatpush3.msra.mxu0 %v2371_v4 }
 0x28e   :  { %2116 = vmatprep.subr.mxu0 %v2310_v2 }
 0x28f   :  { %2117 = vmatpush3.msra.mxu0 %v2385_v6 }
 0x290   :  { %2118 = vmatprep.subr.mxu0 %v2310_v2 }
 0x291   :  { %2119 = vmatpush3.msra.mxu0 %v2401_v8 }
 0x292   :  { %2121 = vmatmul.mubr.msk.f32.vlgmr.msra.gmra.mxu0 %vm40_vm0, %v2277_v50  ;;  %2134 = vmatprep.subr.mxu0 %v2310_v2 }
 0x293   :  { %2135 = vmatpush3.msra.mxu0 %v2354_v0  ;;  %2142 = vmatprep.mubr.msk.f32.mxu0 %vm2311_vm1, %v2310_v2 }
 0x294   :  { %2136 = vmatprep.subr.mxu0 %v2310_v2 }
 0x295   :  { %2137 = vmatpush3.msra.mxu0 %v2366_v3 }
 0x296   :  { %2138 = vmatprep.subr.mxu0 %v2310_v2 }
 0x297   :  { %2139 = vmatpush3.msra.mxu0 %v2380_v5 }
 0x298   :  { %2140 = vmatprep.subr.mxu0 %v2310_v2 }
 0x299   :  { %2141 = vmatpush3.msra.mxu0 %v2394_v7 }
 0x29a   :  { %2156 = vmatprep.subr.mxu0 %v2310_v2  ;;  %2143 = vmatmul.mubr.msk.f32.vlgmr.msra.gmra.mxu0 %vm40_vm0, %v937_v57 }
 0x29b   :  { %2164 = vmatprep.mubr.msk.f32.mxu0 %vm2311_vm1, %v2310_v2  ;;  %2157 = vmatpush3.msra.mxu0 %v1086_v15 }
 0x29c   :  { %2158 = vmatprep.subr.mxu0 %v2310_v2 }
 0x29d   :  { %2159 = vmatpush3.msra.mxu0 %v1085_v16 }
 0x29e   :  { %2160 = vmatprep.subr.mxu0 %v2310_v2 }
 0x29f   :  { %2161 = vmatpush3.msra.mxu0 %v1084_v17 }
 0x2a0   :  { %2162 = vmatprep.subr.mxu0 %v2310_v2 }
 0x2a1   :  { %2163 = vmatpush3.msra.mxu0 %v1083_v18 }
 0x2a2   :  { %2178 = vmatprep.subr.mxu0 %v2310_v2 }
 0x34a   :  { %v708_v59 = vpop.f32.mrf.mxu0 }
 0x34b   :  { %v712_v60 = vadd.f32 %v708_v59, %v486_v58 }
 0x34c   :  { %v2100_v61 = vpop.f32.mrf.mxu0 }
 0x352   :  { %v853_v63 = vpop.f32.mrf.mxu0 }
 0x353   :  { %v857_v9 = vadd.f32 %v853_v63, %v784_v62 }
 0x354   :  { %v2122_v10 = vpop.f32.mrf.mxu0 }
 0x355   :  { %2278 = vtanh.f32 %v857_v9  ;;  %v1881_v10 = vld [vmem:[%s2764_s5] ss:$0 sm:$0xff] }
 0x35a   :  { %v1007_v13 = vpop.f32.mrf.mxu0 }
 0x35b   :  { %v1008_v23 = vadd.f32 %v2451_v11, %v1007_v13 }
 0x35c   :  { %v2144_v14 = vpop.f32.mrf.mxu0 }
 0x362   :  { %v2279_v12 = vpop.eup %2278 }
 0x363   :  { %2132 = vmatmul.mubr.msk.f32.vlgmr.msra.gmra.mxu1 %vm40_vm0, %v2279_v12 }
 0x364   :  { %2146 = vmatpush3.msra.mxu1 %v2359_v1  ;;  %2153 = vmatprep.mubr.msk.f32.mxu1 %vm2311_vm1, %v2310_v2 }
 0x365   :  { %2147 = vmatprep.subr.mxu1 %v2310_v2 }
 0x366   :  { %2148 = vmatpush3.msra.mxu1 %v2371_v4 }
 0x367   :  { %2149 = vmatprep.subr.mxu1 %v2310_v2 }
 0x368   :  { %2150 = vmatpush3.msra.mxu1 %v2385_v6 }
 0x369   :  { %2151 = vmatprep.subr.mxu1 %v2310_v2 }
 0x36a   :  { %2152 = vmatpush3.msra.mxu1 %v2401_v8 }
 0x36b   :  { %2154 = vmatmul.mubr.msk.f32.vlgmr.msra.gmra.mxu1 %vm40_vm0, %v2279_v12  ;;  %2167 = vmatprep.subr.mxu1 %v2310_v2 }
 0x36c   :  { %2168 = vmatpush3.msra.mxu1 %v2354_v0  ;;  %2175 = vmatprep.mubr.msk.f32.mxu1 %vm2311_vm1, %v2310_v2 }
 0x36d   :  { %2169 = vmatprep.subr.mxu1 %v2310_v2 }
 0x36e   :  { %2170 = vmatpush3.msra.mxu1 %v2366_v3 }
 0x36f   :  { %2171 = vmatprep.subr.mxu1 %v2310_v2 }
 0x370   :  { %2172 = vmatpush3.msra.mxu1 %v2380_v5 }
 0x371   :  { %2173 = vmatprep.subr.mxu1 %v2310_v2 }
 0x372   :  { %2174 = vmatpush3.msra.mxu1 %v2394_v7 }
 0x373   :  { %2189 = vmatprep.subr.mxu1 %v2310_v2  ;;  %2176 = vmatmul.mubr.msk.f32.vlgmr.msra.gmra.mxu1 %vm40_vm0, %v1162_v19 }
 0x374   :  { %2197 = vmatprep.mubr.msk.f32.mxu1 %vm2311_vm1, %v2310_v2  ;;  %2190 = vmatpush3.msra.mxu1 %v1310_v30 }
 0x375   :  { %2191 = vmatprep.subr.mxu1 %v2310_v2 }
 0x376   :  { %2192 = vmatpush3.msra.mxu1 %v1309_v31 }
 0x377   :  { %2193 = vmatprep.subr.mxu1 %v2310_v2 }
 0x378   :  { %2194 = vmatpush3.msra.mxu1 %v1308_v32 }
 0x379   :  { %2195 = vmatprep.subr.mxu1 %v2310_v2 }
 0x37a   :  { %2196 = vmatpush3.msra.mxu1 %v1307_v33 }
 0x37b   :  { %2211 = vmatprep.subr.mxu1 %v2310_v2 }
 0x423   :  { %v932_v20 = vpop.f32.mrf.mxu1 }
 0x424   :  { %v936_v21 = vadd.f32 %v932_v20, %v712_v60 }
 0x425   :  { %v2133_v22 = vpop.f32.mrf.mxu1 }
 0x42b   :  { %v1077_v24 = vpop.f32.mrf.mxu1 }
 0x42c   :  { %v1081_v25 = vadd.f32 %v1077_v24, %v1008_v23 }
 0x42d   :  { %v2155_v26 = vpop.f32.mrf.mxu1 }
 0x42e   :  { %2280 = vtanh.f32 %v1081_v25 }
 0x433   :  { %v1231_v28 = vpop.f32.mrf.mxu1 }
 0x434   :  { %v1232_v38 = vadd.f32 %v2451_v11, %v1231_v28 }
 0x435   :  { %v2177_v29 = vpop.f32.mrf.mxu1 }
 0x43b   :  { %v2281_v27 = vpop.eup %2280 }
 0x43c   :  { %2165 = vmatmul.mubr.msk.f32.vlgmr.msra.gmra.mxu0 %vm40_vm0, %v2281_v27 }
 0x43d   :  { %2179 = vmatpush3.msra.mxu0 %v2359_v1  ;;  %2186 = vmatprep.mubr.msk.f32.mxu0 %vm2311_vm1, %v2310_v2 }
 0x43e   :  { %2180 = vmatprep.subr.mxu0 %v2310_v2 }
 0x43f   :  { %2181 = vmatpush3.msra.mxu0 %v2371_v4 }
 0x440   :  { %2182 = vmatprep.subr.mxu0 %v2310_v2 }
 0x441   :  { %2183 = vmatpush3.msra.mxu0 %v2385_v6 }
 0x442   :  { %2184 = vmatprep.subr.mxu0 %v2310_v2 }
 0x443   :  { %2185 = vmatpush3.msra.mxu0 %v2401_v8 }
 0x444   :  { %2187 = vmatmul.mubr.msk.f32.vlgmr.msra.gmra.mxu0 %vm40_vm0, %v2281_v27  ;;  %2200 = vmatprep.subr.mxu0 %v2310_v2 }
 0x445   :  { %2201 = vmatpush3.msra.mxu0 %v2354_v0  ;;  %2208 = vmatprep.mubr.msk.f32.mxu0 %vm2311_vm1, %v2310_v2 }
 0x446   :  { %2202 = vmatprep.subr.mxu0 %v2310_v2 }
 0x447   :  { %2203 = vmatpush3.msra.mxu0 %v2366_v3 }
 0x448   :  { %2204 = vmatprep.subr.mxu0 %v2310_v2 }
 0x449   :  { %2205 = vmatpush3.msra.mxu0 %v2380_v5 }
 0x44a   :  { %2206 = vmatprep.subr.mxu0 %v2310_v2 }
 0x44b   :  { %2207 = vmatpush3.msra.mxu0 %v2394_v7 }
 0x44c   :  { %2222 = vmatprep.subr.mxu0 %v2310_v2  ;;  %2209 = vmatmul.mubr.msk.f32.vlgmr.msra.gmra.mxu0 %vm40_vm0, %v1386_v34 }
 0x44d   :  { %2230 = vmatprep.mubr.msk.f32.mxu0 %vm2311_vm1, %v2310_v2 }
 0x4fc   :  { %v1156_v35 = vpop.f32.mrf.mxu0 }
 0x4fd   :  { %v1160_v36 = vadd.f32 %v1156_v35, %v936_v21 }
 0x4fe   :  { %v2166_v37 = vpop.f32.mrf.mxu0 }
 0x504   :  { %v1301_v39 = vpop.f32.mrf.mxu0 }
 0x505   :  { %v1305_v40 = vadd.f32 %v1301_v39, %v1232_v38 }
 0x506   :  { %v2188_v41 = vpop.f32.mrf.mxu0 }
 0x507   :  { %2282 = vtanh.f32 %v1305_v40 }
 0x50c   :  { %v1455_v43 = vpop.f32.mrf.mxu0 }
 0x50d   :  { %v1456_v49 = vadd.f32 %v2451_v11, %v1455_v43 }
 0x50e   :  { %v2210_v44 = vpop.f32.mrf.mxu0 }
 0x514   :  { %v2283_v42 = vpop.eup %2282 }
 0x515   :  { %2198 = vmatmul.mubr.msk.f32.vlgmr.msra.gmra.mxu1 %vm40_vm0, %v2283_v42 }
 0x516   :  { %2212 = vmatpush3.msra.mxu1 %v2359_v1  ;;  %2219 = vmatprep.mubr.msk.f32.mxu1 %vm2311_vm1, %v2310_v2 }
 0x517   :  { %2213 = vmatprep.subr.mxu1 %v2310_v2 }
 0x518   :  { %2214 = vmatpush3.msra.mxu1 %v2371_v4 }
 0x519   :  { %2215 = vmatprep.subr.mxu1 %v2310_v2 }
 0x51a   :  { %2216 = vmatpush3.msra.mxu1 %v2385_v6 }
 0x51b   :  { %2217 = vmatprep.subr.mxu1 %v2310_v2 }
 0x51c   :  { %2218 = vmatpush3.msra.mxu1 %v2401_v8 }
 0x51d   :  { %2220 = vmatmul.mubr.msk.f32.vlgmr.msra.gmra.mxu1 %vm40_vm0, %v2283_v42  ;;  %2233 = vmatprep.subr.mxu1 %v2310_v2 }
 0x51e   :  { %2234 = vmatpush3.msra.mxu1 %v2354_v0  ;;  %2241 = vmatprep.mubr.msk.f32.mxu1 %vm2311_vm1, %v2310_v2  ;;  %v1534_v0 = vld [vmem:[%s2763_s4 + $0xd8] sm:$0xff] }
 0x51f   :  { %2235 = vmatprep.subr.mxu1 %v2310_v2  ;;  %2223 = vmatpush3.msra.mxu0 %v1534_v0 }
 0x520   :  { %2236 = vmatpush3.msra.mxu1 %v2366_v3  ;;  %v1533_v3 = vld [vmem:[%s2763_s4 + $0xd0] sm:$0xff]  ;;  %2224 = vmatprep.subr.mxu0 %v2310_v2 }
 0x521   :  { %2237 = vmatprep.subr.mxu1 %v2310_v2  ;;  %2225 = vmatpush3.msra.mxu0 %v1533_v3 }
 0x522   :  { %2238 = vmatpush3.msra.mxu1 %v2380_v5  ;;  %v1532_v5 = vld [vmem:[%s2763_s4 + $0xc8] sm:$0xff]  ;;  %2226 = vmatprep.subr.mxu0 %v2310_v2 }
 0x523   :  { %2239 = vmatprep.subr.mxu1 %v2310_v2  ;;  %2227 = vmatpush3.msra.mxu0 %v1532_v5 }
 0x524   :  { %2240 = vmatpush3.msra.mxu1 %v2394_v7  ;;  %v1531_v7 = vld [vmem:[%s2763_s4 + $0xc0] sm:$0xff]  ;;  %2228 = vmatprep.subr.mxu0 %v2310_v2 }
 0x525   :  { %2255 = vmatprep.subr.mxu1 %v2310_v2  ;;  %2229 = vmatpush3.msra.mxu0 %v1531_v7 }
 0x526   :  { %2244 = vmatprep.subr.mxu0 %v2310_v2  ;;  %2242 = vmatmul.mubr.msk.f32.vlgmr.msra.gmra.mxu1 %vm40_vm0, %v1610_v45 }
 0x527   :  { %2263 = vmatprep.mubr.msk.f32.mxu1 %vm2311_vm1, %v2310_v2 }
 0x5d5   :  { %v1380_v46 = vpop.f32.mrf.mxu1 }
 0x5d6   :  { %v1384_v47 = vadd.f32 %v1380_v46, %v1160_v36 }
 0x5d7   :  { %v2199_v48 = vpop.f32.mrf.mxu1 }
 0x5dd   :  { %v1525_v50 = vpop.f32.mrf.mxu1 }
 0x5de   :  { %v1529_v51 = vadd.f32 %v1525_v50, %v1456_v49 }
 0x5df   :  { %v2221_v52 = vpop.f32.mrf.mxu1 }
 0x5e0   :  { %2284 = vtanh.f32 %v1529_v51 }
 0x5e6   :  { %v1679_v54 = vpop.f32.mrf.mxu1 }
 0x5e7   :  { %v1680_v59 = vadd.f32 %v2451_v11, %v1679_v54 }
 0x5e8   :  { %v2243_v55 = vpop.f32.mrf.mxu1 }
 0x5ed   :  { %v2285_v53 = vpop.eup %2284 }
 0x5ee   :  { %2231 = vmatmul.mubr.msk.f32.vlgmr.msra.gmra.mxu0 %vm40_vm0, %v2285_v53 }
 0x5ef   :  { %2245 = vmatpush3.msra.mxu0 %v2359_v1  ;;  %2252 = vmatprep.mubr.msk.f32.mxu0 %vm2311_vm1, %v2310_v2  ;;  %v1758_v1 = vld [vmem:[%s2763_s4 + $0xf8] sm:$0xff] }
 0x5f0   :  { %2246 = vmatprep.subr.mxu0 %v2310_v2  ;;  %2256 = vmatpush3.msra.mxu1 %v1758_v1 }
 0x5f1   :  { %2247 = vmatpush3.msra.mxu0 %v2371_v4  ;;  %v1757_v4 = vld [vmem:[%s2763_s4 + $0xf0] sm:$0xff]  ;;  %2257 = vmatprep.subr.mxu1 %v2310_v2 }
 0x5f2   :  { %2248 = vmatprep.subr.mxu0 %v2310_v2  ;;  %2258 = vmatpush3.msra.mxu1 %v1757_v4 }
 0x5f3   :  { %2249 = vmatpush3.msra.mxu0 %v2385_v6  ;;  %v1756_v6 = vld [vmem:[%s2763_s4 + $0xe8] sm:$0xff]  ;;  %2259 = vmatprep.subr.mxu1 %v2310_v2 }
 0x5f4   :  { %2250 = vmatprep.subr.mxu0 %v2310_v2  ;;  %2260 = vmatpush3.msra.mxu1 %v1756_v6 }
 0x5f5   :  { %2251 = vmatpush3.msra.mxu0 %v2401_v8  ;;  %v1755_v8 = vld [vmem:[%s2763_s4 + $0xe0] sm:$0xff]  ;;  %2261 = vmatprep.subr.mxu1 %v2310_v2  ;;  %s2315_s4 = smov [#allocation2]  }
 0x5f6   :  { %2253 = vmatmul.mubr.msk.f32.vlgmr.msra.gmra.mxu0 %vm40_vm0, %v2285_v53  ;;  %2262 = vmatpush3.msra.mxu1 %v1755_v8  ;;  %s1849_s29 = sshll.u32 %s2315_s4, 4  ;;  %s1850_s29 = int_to_ptr.vmem [resolvable:$true] %s1849_s29 }
 0x5f7   :  { %s2288_s30 = scalar_lea.vmem %s1850_s29, 128  ;;  %p2293_p1 = scmp.lt.s32.totalorder %s1850_s29, %s1850_s29 }
 0x5f8   :  { %p2289_p0 = scmp.ne.s32.totalorder %s1850_s29, %s2288_s30  ;;  %p2294_p2 = scmp.lt.s32.totalorder %s2288_s30, %s2288_s30 }
 0x5fa   :  { %p2295_p3 = por %p2294_p2, %p2293_p1 }
 0x5fc   :  { %p2296_p4 = pnand %p2295_p3, %p2289_p0 }
 0x6ae   :  { %v1604_v56 = vpop.f32.mrf.mxu0 }
 0x6af   :  { %v1608_v57 = vadd.f32 %v1604_v56, %v1384_v47 }
 0x6b0   :  { %v2232_v58 = vpop.f32.mrf.mxu0 }
 0x6b6   :  { %v1749_v60 = vpop.f32.mrf.mxu0 }
 0x6b7   :  { %v1753_v61 = vadd.f32 %v1749_v60, %v1680_v59 }
 0x6b8   :  { %v2254_v62 = vpop.f32.mrf.mxu0 }
 0x6b9   :  { %2286 = vtanh.f32 %v1753_v61 }
 0x6c6   :  { %v2287_v63 = vpop.eup %2286 }
 0x6c7   :  { %2264 = vmatmul.mubr.msk.f32.vlgmr.msra.gmra.mxu1 %vm40_vm0, %v2287_v63 }
 0x787   :  { %v1828_v9 = vpop.f32.mrf.mxu1 }
 0x788   :  { %v1832_v2 = vadd.f32 %v1828_v9, %v1608_v57 }
 0x789   :  { %v2265_v12 = vpop.f32.mrf.mxu1 }
 0x78a   :  { %v1840_v13 = vadd.f32 %v1881_v10, %v1832_v2 }
 0x78c   :  { %1842 = vst.msk [vmem:[#allocation2] sm:$0xff] %vm1841_vm2, %v1840_v13 }
 0x78d   :  { %2299 = shalt.err (!%p2296_p4)
}
 0x78e   :  { %1852 = dma.vmem_to_hbm [thread:$0]  %s1850_s29, 128, %s2765_s6, [#allocation3]  }
 0x78f   :  { %2308 = dma.done.wait [#allocation3], 128  }
 0x790   :  { %2309 = vsyncadd [#allocation3], 4294967168 }
 0x791   :  { %1856 = vsyncpa [#allocation3], 1 }

</bundles_post_ra>
